<compile_context>
chip_gen: v6e
topology: v6e:2x2x1
jax: 0.10.0
libtpu: 0.0.40
codegen_flags: <defaults>
</compile_context>

<pallas_src>
import functools

import jax
import jax.numpy as jnp
from jax.experimental import pallas as pl
from jax.experimental.pallas import tpu as pltpu  # noqa: F401  (TPU backend)


def _param_identity_kernel(p_ref, o_ref):
    # forward() returns the stored parameter unchanged: a straight VMEM copy.
    o_ref[...] = p_ref[...]


@functools.lru_cache(maxsize=None)
def _build_param_forward(shape, dtype_name):
    """Compile (once per shape/dtype) the identity pass-through kernel."""
    dtype = jnp.dtype(dtype_name)
    nd = len(shape)
    # Full-array block: always a legal block shape, single grid step, no
    # pipelining machinery needed for a small parameter tensor.
    spec = pl.BlockSpec(shape, lambda _nd=nd: (0,) * _nd)
    kernel = pl.pallas_call(
        _param_identity_kernel,
        out_shape=jax.ShapeDtypeStruct(shape, dtype),
        in_specs=[spec],
        out_specs=spec,
        grid=(),
    )
    return jax.jit(kernel)


def bound_params_forward(param):
    """Equivalent of BoundParams.forward(): returns the stored parameter."""
    param = jnp.asarray(param)
    fwd = _build_param_forward(tuple(param.shape), str(param.dtype))
    return fwd(param)


class BoundInput:
    """Minimal JAX port of the auto_LiRPA BoundInput node."""

    def __init__(self, input_name, name, ori_name, value, perturbation=None):
        self.input_name = input_name
        self.output_name = []
        self.name = name
        self.ori_name = ori_name
        self.forward_value = None
        self.bounded = False
        self.value = value
        self.perturbation = perturbation

    def forward(self):
        return self.value

    # TODO(synk): bound_forward / bound_backward / interval_propagate are
    # `assert 0` in the reference module, so they are intentionally omitted.


class BoundParams(BoundInput):
    """Minimal JAX port of the auto_LiRPA BoundParams node."""

    def __init__(self, input_name, name, ori_name, value, perturbation=None):
        super().__init__(input_name, name, ori_name, None, perturbation)
        # JAX has no nn.Parameter; the parameter is just an immutable array.
        self.param = jnp.asarray(value)
        self._cached_forward_value = None

    def forward(self):
        # Parameters are immutable JAX arrays, so the forward result can be
        # cached: repeat forward() calls in a bound computation are free.
        if self._cached_forward_value is None:
            self._cached_forward_value = bound_params_forward(self.param)
        return self._cached_forward_value


if __name__ == "__main__":
    key = jax.random.PRNGKey(0)
    # Small, tile-aligned parameter: hidden=32 rows x 128 lanes, float32.
    param = jax.random.normal(key, (32, 128), dtype=jnp.float32)

    node = BoundParams(
        input_name=[], name="params_0", ori_name="linear.weight",
        value=param, perturbation=None,
    )

    out = node.forward()
    out = jax.block_until_ready(out)

    assert out.shape == param.shape, f"expected {param.shape}, got {out.shape}"
    assert out.dtype == param.dtype, f"expected {param.dtype}, got {out.dtype}"
    assert bool(jnp.array_equal(out, param)), "forward() must return the stored parameter"

    # Second call hits the instance cache (no re-dispatch).
    out2 = jax.block_until_ready(node.forward())
    assert out2 is out

    print("KERNEL_OK")
</pallas_src>

<mosaic_0001>
module attributes {stable_mosaic.version = 11 : i64} {
  func.func @_param_identity_kernel(%arg0: memref<32x128xf32, #tpu.memory_space<vmem>>, %arg1: memref<32x128xf32, #tpu.memory_space<vmem>>) attributes {dimension_semantics = [], scalar_prefetch = 0 : i64, scratch_operands = 0 : i64, tpu.core_type = #tpu.core_type<tc>} {
    %c0 = arith.constant 0 : index
    %c0_0 = arith.constant 0 : index
    %0 = vector.load %arg0[%c0, %c0_0] : memref<32x128xf32, #tpu.memory_space<vmem>>, vector<32x128xf32>
    %c0_1 = arith.constant 0 : index
    %c0_2 = arith.constant 0 : index
    %1 = vector.load %arg1[%c0_1, %c0_2] : memref<32x128xf32, #tpu.memory_space<vmem>>, vector<32x128xf32>
    tpu.vector_store %arg1[%c0_1, %c0_2], %0 {strides = array<i32>} : memref<32x128xf32, #tpu.memory_space<vmem>>, vector<32x128xf32>,
    return
  }
}

</mosaic_0001>

<bundles_post_ra>
// kernel: tpu_custom_call.1
= control target key start
LH: loop header
LB: loop body
LE: loop exit
PB: predicated region body
PF: predicated region fallthrough
CT: control target
= control target key end

     0   :  { %6 = vsyncpa [#allocation3], 0  ;;  %s116_s0 = inlined_call_operand.hbm [shape: f32[32,128], index: 0, kind: input, shape index: {}]   ;;  %s117_s1 = inlined_call_operand.hbm [shape: f32[32,128], index: 1, kind: output, shape index: {}]  }
   0x1   :  { %7 = vsyncpa [#allocation4], 0  ;;  %s96_s6 = smov [#allocation2]  }
   0x2   :  { %s13_s7 = sshll.u32 %s96_s6, 4  ;;  %s14_s7 = int_to_ptr.vmem [resolvable:$true] %s13_s7 }
   0x3   :  { %s60_s8 = scalar_lea.vmem %s14_s7, 512  ;;  %p65_p1 = scmp.lt.s32.totalorder %s14_s7, %s14_s7 }
   0x4   :  { %p61_p0 = scmp.ne.s32.totalorder %s14_s7, %s60_s8  ;;  %p66_p2 = scmp.lt.s32.totalorder %s60_s8, %s60_s8 }
   0x6   :  { %p67_p3 = por %p66_p2, %p65_p1 }
   0x8   :  { %p68_p4 = pnand %p67_p3, %p61_p0 }
   0xa   :  { %71 = shalt.err (!%p68_p4)
}
   0xb   :  { %s97_s9 = smov 128   ;;  %s98_s10 = smov 8  }
   0xc   :  { %19 = dma.hbm_to_vmem [thread:$0]  %s116_s0, 512, %s14_s7, [#allocation3], %s97_s9, %s97_s9, %s98_s10  }
   0xd   :  { %92 = dma.done.wait [#allocation3], 512  }
   0xe   :  { %93 = vsyncadd [#allocation3], 4294966784  ;;  %s99_s13 = smov [#allocation5]   ;;  %v23_v0 = vld [vmem:[#allocation2] sm:$0xff]  ;;  %v24_v1 = vld [vmem:[#allocation2 + $0x8] sm:$0xff] }
   0xf   :  { %s36_s14 = sshll.u32 %s99_s13, 4  ;;  %v25_v2 = vld [vmem:[#allocation2 + $0x10] sm:$0xff]  ;;  %27 = vst [vmem:[#allocation5] sm:$0xff] %v23_v0  ;;  %28 = vst [vmem:[#allocation5 + $0x8] sm:$0xff] %v24_v1  ;;  %v26_v3 = vld [vmem:[#allocation2 + $0x18] sm:$0xff]  ;;  %s37_s14 = int_to_ptr.vmem [resolvable:$true] %s36_s14 }
  0x10   :  { %29 = vst [vmem:[#allocation5 + $0x10] sm:$0xff] %v25_v2  ;;  %30 = vst [vmem:[#allocation5 + $0x18] sm:$0xff] %v26_v3  ;;  %s72_s15 = scalar_lea.vmem %s37_s14, 512  ;;  %p77_p6 = scmp.lt.s32.totalorder %s37_s14, %s37_s14 }
  0x11   :  { %p73_p5 = scmp.ne.s32.totalorder %s37_s14, %s72_s15  ;;  %p78_p7 = scmp.lt.s32.totalorder %s72_s15, %s72_s15 }
  0x13   :  { %p79_p8 = por %p78_p7, %p77_p6 }
  0x15   :  { %p80_p9 = pnand %p79_p8, %p73_p5 }
  0x17   :  { %83 = shalt.err (!%p80_p9)
}
  0x18   :  { %42 = dma.vmem_to_hbm [thread:$0]  %s37_s14, 512, %s117_s1, [#allocation4], %s97_s9, %s97_s9, %s98_s10  }
  0x19   :  { %94 = dma.done.wait [#allocation4], 512  }
  0x1a   :  { %95 = vsyncadd [#allocation4], 4294966784 }
  0x1b   :  { %46 = vsyncpa [#allocation3], 1 }
  0x1c   :  { %47 = vsyncpa [#allocation4], 1 }

</bundles_post_ra>
